<compile_context>
chip_gen: v5e
topology: v5e:2x2
jax: 0.10.0
libtpu: 0.0.40
codegen_flags: <defaults>
</compile_context>

<pallas_src>
import jax
import jax.numpy as jnp
from jax.experimental import pallas as pl
from jax.experimental.pallas import tpu as pltpu

_LANE = 128
_MAX_BLOCK_ROWS = 1024  # 1024x128 f32 = 512 KiB / block; fine vs v7x 64 MiB VMEM


def _add_scalar_kernel(s_ref, x_ref, o_ref):
    # s_ref: (1,) scalar in SMEM; x_ref / o_ref: (block_rows, 128) VMEM tiles.
    # Single add per tile — no extra VALU filler (v5e single-vst bound).
    o_ref[...] = x_ref[...] + s_ref[0]


def _dropout_scalar(value, p, training, key):
    """torch.nn.Dropout applied to a scalar constant."""
    if (not training) or p == 0.0:
        return jnp.float32(value)
    if p >= 1.0:
        # Dropout(p=1) in training mode: output is always 0 (deterministic).
        return jnp.float32(0.0)
    # Stochastic path (0 < p < 1): keep with prob (1-p), scale by 1/(1-p).
    keep = jax.random.bernoulli(key, 1.0 - p)
    return jnp.where(keep, jnp.float32(value) / (1.0 - p), jnp.float32(0.0))


def _add_scalar_pallas(x, s):
    """out = x + s via a tiled, pipelined Pallas kernel (s is a scalar)."""
    orig_shape = x.shape
    flat = x.reshape(-1)
    n = flat.shape[0]

    rows = pl.cdiv(n, _LANE)
    block_rows = rows if rows <= _MAX_BLOCK_ROWS else _MAX_BLOCK_ROWS
    rows_padded = pl.cdiv(rows, block_rows) * block_rows
    n_padded = rows_padded * _LANE
    if n_padded != n:
        flat = jnp.pad(flat, (0, n_padded - n))
    x2 = flat.reshape(rows_padded, _LANE)

    s_arr = jnp.asarray(s, dtype=x.dtype).reshape((1,))

    out2 = pl.pallas_call(
        _add_scalar_kernel,
        out_shape=jax.ShapeDtypeStruct((rows_padded, _LANE), x.dtype),
        grid=(rows_padded // block_rows,),
        in_specs=[
            pl.BlockSpec(memory_space=pltpu.SMEM),                # scalar sum
            pl.BlockSpec((block_rows, _LANE), lambda i: (i, 0)),  # x tile
        ],
        out_specs=pl.BlockSpec((block_rows, _LANE), lambda i: (i, 0)),
        input_output_aliases={1: 0},  # reuse x's buffer for the output
        compiler_params=pltpu.CompilerParams(
            dimension_semantics=("parallel",)),
    )(s_arr, x2)

    out_flat = out2.reshape(-1)
    if n_padded != n:
        out_flat = out_flat[:n]
    return out_flat.reshape(orig_shape)


def model_forward(x, p=1.0, training=True, key=None):
    """Reproduces model(p).forward(x)."""
    # Short-circuit: with p >= 1 in training mode, all three dropout outputs
    # are identically 0 at trace time, so out == x.  Skip the kernel entirely.
    if training and p >= 1.0:
        return x

    if key is None:
        key = jax.random.PRNGKey(0)
    k1, k2, k3 = jax.random.split(key, 3)
    v1 = _dropout_scalar(1.0, p, training, k1)
    v2 = _dropout_scalar(2.0, p, training, k2)
    v3 = _dropout_scalar(3.0, p, training, k3)
    s = (v1 + v2 + v3).astype(x.dtype)

    return _add_scalar_pallas(x, s)


if __name__ == "__main__":
    key = jax.random.PRNGKey(0)
    # NCHW input, small shape: batch=2, channels=4, spatial=16x16
    x = jax.random.normal(key, (2, 4, 16, 16), dtype=jnp.float32)

    # 1) The module as specified (p=1, training mode): out == x, short-circuit.
    out_train = jax.block_until_ready(model_forward(x, p=1.0, training=True))
    assert out_train.shape == x.shape and out_train.dtype == x.dtype
    assert jnp.allclose(out_train, x), "training-mode (p=1) mismatch vs reference"

    # 2) Eval-mode path exercises the Pallas kernel (dropout is identity,
    #    s = 1 + 2 + 3 = 6), verifying it compiles and runs on TPU.
    out_eval = jax.block_until_ready(model_forward(x, p=1.0, training=False))
    assert out_eval.shape == x.shape and out_eval.dtype == x.dtype
    assert jnp.allclose(out_eval, x + 6.0), "eval-mode mismatch vs reference"

    print("KERNEL_OK")
</pallas_src>

<mosaic_0001>
module attributes {stable_mosaic.version = 11 : i64} {
  func.func @_add_scalar_kernel(%arg0: i32, %arg1: memref<1xf32, #tpu.memory_space<smem>>, %arg2: memref<16x128xf32, #tpu.memory_space<vmem>>, %arg3: memref<16x128xf32, #tpu.memory_space<vmem>>) attributes {dimension_semantics = [#tpu.dimension_semantics<parallel>], iteration_bounds = array<i64: 1>, scalar_prefetch = 0 : i64, scratch_operands = 0 : i64, tpu.core_type = #tpu.core_type<tc>, window_params = [{transform_indices = @transform_0, window_bounds = array<i64: 1>}, {transform_indices = @transform_1, window_bounds = array<i64: 16, 128>}, {transform_indices = @transform_2, window_bounds = array<i64: 16, 128>}]} {
    %c0 = arith.constant 0 : index
    %c0_0 = arith.constant 0 : index
    %0 = vector.load %arg2[%c0, %c0_0] : memref<16x128xf32, #tpu.memory_space<vmem>>, vector<16x128xf32>
    %c0_1 = arith.constant 0 : index
    %1 = memref.load %arg1[%c0_1] : memref<1xf32, #tpu.memory_space<smem>>
    %2 = vector.broadcast %1 : f32 to vector<16x128xf32>
    %3 = arith.addf %0, %2 : vector<16x128xf32>
    %c0_2 = arith.constant 0 : index
    %c0_3 = arith.constant 0 : index
    %4 = vector.load %arg3[%c0_2, %c0_3] : memref<16x128xf32, #tpu.memory_space<vmem>>, vector<16x128xf32>
    tpu.vector_store %arg3[%c0_2, %c0_3], %3 {strides = array<i32>} : memref<16x128xf32, #tpu.memory_space<vmem>>, vector<16x128xf32>,
    return
  }
  func.func @transform_0(%arg0: i32) -> i32 {
    %c0_i32 = arith.constant 0 : i32
    %c0_i32_0 = arith.constant 0 : i32
    return %c0_i32 : i32
  }
  func.func @transform_1(%arg0: i32) -> (i32, i32) {
    %c0_i32 = arith.constant 0 : i32
    %c0_i32_0 = arith.constant 0 : i32
    return %arg0, %c0_i32 : i32, i32
  }
  func.func @transform_2(%arg0: i32) -> (i32, i32) {
    %c0_i32 = arith.constant 0 : i32
    %c0_i32_0 = arith.constant 0 : i32
    return %arg0, %c0_i32 : i32, i32
  }
}

</mosaic_0001>

<bundles_post_ra>
// kernel: tpu_custom_call.1
= control target key start
LH: loop header
LB: loop body
LE: loop exit
PB: predicated region body
PF: predicated region fallthrough
CT: control target
= control target key end

     0   :  { %8 = vsyncpa [#allocation4], 0  ;;  %s140_s0 = inlined_call_operand.<no memory space> [shape: f32[1], index: 0, kind: input, shape index: {}]   ;;  %s141_s1 = inlined_call_operand.hbm [shape: f32[16,128], index: 1, kind: input, shape index: {}, may-alias: {1,2}]   ;;  %s142_s2 = inlined_call_operand.hbm [shape: f32[16,128], index: 2, kind: output, shape index: {}, may-alias: {1,2}]  }
   0x1   :  { %9 = vsyncpa [#allocation5], 0  ;;  %s16_s11 = sshll.u32 %s141_s1, 4  ;;  %s112_s12 = smov [#allocation3]   ;;  %s17_s11 = int_to_ptr.hbm [resolvable:$true] %s16_s11 }
   0x2   :  { %s18_s13 = sshll.u32 %s112_s12, 4  ;;  %s113_s14 = smov 128   ;;  %s19_s13 = int_to_ptr.vmem [resolvable:$true] %s18_s13 }
   0x3   :  { %s114_s15 = smov 8  }
   0x4   :  { %24 = dma.hbm_to_vmem [thread:$0]  %s17_s11, 256, %s19_s13, [#allocation4], %s113_s14, %s113_s14, %s114_s15  }
   0x5   :  { %108 = dma.done.wait [#allocation4], 256  }
   0x6   :  { %109 = vsyncadd [#allocation4], 4294967040  ;;  %v32_v0 = vstv %s140_s0  ;;  %s115_s18 = smov [#allocation6]   ;;  %s43_s22 = sshll.u32 %s142_s2, 4  ;;  %v29_v1 = vld [vmem:[#allocation3] sm:$0xff]  ;;  %v30_v2 = vld [vmem:[#allocation3 + $0x8] sm:$0xff]  ;;  %s44_s22 = int_to_ptr.hbm [resolvable:$true] %s43_s22 }
   0x7   :  { %s41_s19 = sshll.u32 %s115_s18, 4  ;;  %v33_v3 = vadd.f32 %v32_v0, %v29_v1  ;;  %v34_v4 = vadd.f32 %v32_v0, %v30_v2  ;;  %s42_s19 = int_to_ptr.vmem [resolvable:$true] %s41_s19 }
   0x9   :  { %35 = vst [vmem:[#allocation6] sm:$0xff] %v33_v3 }
   0xa   :  { %36 = vst [vmem:[#allocation6 + $0x8] sm:$0xff] %v34_v4 }
   0xb   :  { %49 = dma.vmem_to_hbm [thread:$0]  %s42_s19, 256, %s44_s22, [#allocation5], %s113_s14, %s113_s14, %s114_s15  }
   0xc   :  { %110 = dma.done.wait [#allocation5], 256  }
   0xd   :  { %111 = vsyncadd [#allocation5], 4294967040 }
   0xe   :  { %54 = vsyncpa [#allocation4], 1 }
   0xf   :  { %55 = vsyncpa [#allocation5], 1 }

</bundles_post_ra>
